<compile_context>
chip_gen: v7x
topology: tpu7x:2x2x1
jax: 0.10.0
libtpu: 0.0.40
codegen_flags: <defaults>
</compile_context>

<pallas_src>
import jax
import jax.numpy as jnp
from jax.experimental import pallas as pl
from jax.experimental.pallas import tpu as pltpu

# ---- model config (small but consistent with the module) ----
FEATURES_DIM = 32
FRAMES_STACK = 4
IN_DIM = FRAMES_STACK * FEATURES_DIM      # 128  (obs_latent width)
HID1 = 512
HID2 = 256
OUT_DIM = FRAMES_STACK * FEATURES_DIM     # 128
BATCH = 2


# --------------------------- fused MLP kernel --------------------------------
def _predictor_kernel(x_ref, a_ref, w1_ref, wa_ref, b1_ref,
                      w2_ref, b2_ref, w3_ref, b3_ref, o_ref):
    # x_ref : (bm, IN_DIM)   VMEM      a_ref : (bm, 1) VMEM
    # w1_ref: (IN_DIM, HID1) wa_ref: (1, HID1)  b1_ref: (1, HID1)
    # w2_ref: (HID1, HID2)   b2_ref: (1, HID2)
    # w3_ref: (HID2, OUT)    b3_ref: (1, OUT)
    # o_ref : (bm, OUT)
    #
    # Layer 1: cat([x, act]) @ W1 == x @ W1[:D] + act * W1[D]  (rank-1 term)
    h1 = jnp.dot(x_ref[...], w1_ref[...], preferred_element_type=jnp.float32)
    h1 = h1 + a_ref[...] * wa_ref[...] + b1_ref[...]
    h1 = jnp.maximum(h1, 0.0)
    # Layer 2
    h2 = jnp.dot(h1, w2_ref[...], preferred_element_type=jnp.float32)
    h2 = jnp.maximum(h2 + b2_ref[...], 0.0)
    # Layer 3 (no relu)
    o = jnp.dot(h2, w3_ref[...], preferred_element_type=jnp.float32)
    o_ref[...] = o + b3_ref[...]


def predictor_in_latent_forward(obs_latent, act, params):
    """Fused Pallas forward: cat -> Linear/ReLU -> Linear/ReLU -> Linear."""
    b, d = obs_latent.shape
    n1 = params["w1_obs"].shape[1]
    n2 = params["w2"].shape[1]
    n3 = params["w3"].shape[1]

    # mirrors torch.tensor(act).view(-1, 1)
    act2d = jnp.asarray(act, jnp.float32).reshape(-1, 1)

    # Single batch tile here (batch is tiny); the batch grid axis is kept and
    # marked "parallel" so larger batches shard across TensorCores (v7x).
    bm = b
    grid = (pl.cdiv(b, bm),)

    return pl.pallas_call(
        _predictor_kernel,
        out_shape=jax.ShapeDtypeStruct((b, n3), jnp.float32),
        grid=grid,
        in_specs=[
            pl.BlockSpec((bm, d), lambda i: (i, 0)),      # obs_latent
            pl.BlockSpec((bm, 1), lambda i: (i, 0)),      # act
            pl.BlockSpec((d, n1), lambda i: (0, 0)),      # W1 (obs rows)
            pl.BlockSpec((1, n1), lambda i: (0, 0)),      # W1 (act row)
            pl.BlockSpec((1, n1), lambda i: (0, 0)),      # b1
            pl.BlockSpec((n1, n2), lambda i: (0, 0)),     # W2
            pl.BlockSpec((1, n2), lambda i: (0, 0)),      # b2
            pl.BlockSpec((n2, n3), lambda i: (0, 0)),     # W3
            pl.BlockSpec((1, n3), lambda i: (0, 0)),      # b3
        ],
        out_specs=pl.BlockSpec((bm, n3), lambda i: (i, 0)),
        compiler_params=pltpu.CompilerParams(
            dimension_semantics=("parallel",),
        ),
    )(obs_latent, act2d,
      params["w1_obs"], params["w1_act"], params["b1"].reshape(1, n1),
      params["w2"], params["b2"].reshape(1, n2),
      params["w3"], params["b3"].reshape(1, n3))


# ------------------------ pure-JAX reference (check) -------------------------
def predictor_reference(obs_latent, act, params):
    hi = jax.lax.Precision.HIGHEST
    x = jnp.concatenate(
        [obs_latent, jnp.asarray(act, jnp.float32).reshape(-1, 1)], axis=1)
    w1_full = jnp.concatenate([params["w1_obs"], params["w1_act"]], axis=0)
    h1 = jnp.maximum(jnp.dot(x, w1_full, precision=hi) + params["b1"], 0.0)
    h2 = jnp.maximum(jnp.dot(h1, params["w2"], precision=hi) + params["b2"], 0.0)
    return jnp.dot(h2, params["w3"], precision=hi) + params["b3"]


# ------------------------------ params / main --------------------------------
def init_params(key):
    ks = jax.random.split(key, 7)
    s = 0.05
    return {
        # first Linear weight stored pre-split: obs rows + action row
        # (equivalent to nn.Linear(frames_stack*features_dim + 1, 512))
        "w1_obs": s * jax.random.normal(ks[0], (IN_DIM, HID1), jnp.float32),
        "w1_act": s * jax.random.normal(ks[1], (1, HID1), jnp.float32),
        "b1": s * jax.random.normal(ks[2], (HID1,), jnp.float32),
        "w2": s * jax.random.normal(ks[3], (HID1, HID2), jnp.float32),
        "b2": s * jax.random.normal(ks[4], (HID2,), jnp.float32),
        "w3": s * jax.random.normal(ks[5], (HID2, OUT_DIM), jnp.float32),
        "b3": s * jax.random.normal(ks[6], (OUT_DIM,), jnp.float32),
    }


if __name__ == "__main__":
    key = jax.random.PRNGKey(0)
    k_obs, k_act, k_p = jax.random.split(key, 3)
    params = init_params(k_p)
    obs_latent = jax.random.normal(k_obs, (BATCH, IN_DIM), jnp.float32)
    act = jax.random.normal(k_act, (BATCH,), jnp.float32)

    out = jax.block_until_ready(
        predictor_in_latent_forward(obs_latent, act, params))
    assert out.shape == (BATCH, OUT_DIM), out.shape
    assert out.dtype == jnp.float32

    ref = jax.block_until_ready(predictor_reference(obs_latent, act, params))
    max_err = float(jnp.max(jnp.abs(out - ref)))
    assert jnp.allclose(out, ref, rtol=2e-2, atol=2e-2), max_err

    print("KERNEL_OK")
</pallas_src>

<mosaic_0001>
module attributes {stable_mosaic.version = 11 : i64} {
  func.func @_predictor_kernel(%arg0: i32, %arg1: memref<2x128xf32, #tpu.memory_space<vmem>>, %arg2: memref<2x1xf32, #tpu.memory_space<vmem>>, %arg3: memref<128x512xf32, #tpu.memory_space<vmem>>, %arg4: memref<1x512xf32, #tpu.memory_space<vmem>>, %arg5: memref<1x512xf32, #tpu.memory_space<vmem>>, %arg6: memref<512x256xf32, #tpu.memory_space<vmem>>, %arg7: memref<1x256xf32, #tpu.memory_space<vmem>>, %arg8: memref<256x128xf32, #tpu.memory_space<vmem>>, %arg9: memref<1x128xf32, #tpu.memory_space<vmem>>, %arg10: memref<2x128xf32, #tpu.memory_space<vmem>>) attributes {dimension_semantics = [#tpu.dimension_semantics<parallel>], iteration_bounds = array<i64: 1>, scalar_prefetch = 0 : i64, scratch_operands = 0 : i64, tpu.core_type = #tpu.core_type<tc>, window_params = [{transform_indices = @transform_0, window_bounds = array<i64: 2, 128>}, {transform_indices = @transform_1, window_bounds = array<i64: 2, 1>}, {pipeline_mode = #tpu.pipeline_mode<synchronous>, transform_indices = @transform_2, window_bounds = array<i64: 128, 512>}, {pipeline_mode = #tpu.pipeline_mode<synchronous>, transform_indices = @transform_3, window_bounds = array<i64: 1, 512>}, {pipeline_mode = #tpu.pipeline_mode<synchronous>, transform_indices = @transform_4, window_bounds = array<i64: 1, 512>}, {pipeline_mode = #tpu.pipeline_mode<synchronous>, transform_indices = @transform_5, window_bounds = array<i64: 512, 256>}, {pipeline_mode = #tpu.pipeline_mode<synchronous>, transform_indices = @transform_6, window_bounds = array<i64: 1, 256>}, {pipeline_mode = #tpu.pipeline_mode<synchronous>, transform_indices = @transform_7, window_bounds = array<i64: 256, 128>}, {pipeline_mode = #tpu.pipeline_mode<synchronous>, transform_indices = @transform_8, window_bounds = array<i64: 1, 128>}, {transform_indices = @transform_9, window_bounds = array<i64: 2, 128>}]} {
    %c0 = arith.constant 0 : index
    %c0_0 = arith.constant 0 : index
    %0 = vector.load %arg1[%c0, %c0_0] : memref<2x128xf32, #tpu.memory_space<vmem>>, vector<2x128xf32>
    %c0_1 = arith.constant 0 : index
    %c0_2 = arith.constant 0 : index
    %1 = vector.load %arg3[%c0_1, %c0_2] : memref<128x512xf32, #tpu.memory_space<vmem>>, vector<128x512xf32>
    %cst = arith.constant dense<0.000000e+00> : vector<2x512xf32>
    %2 = tpu.matmul %0, %1, %cst {dimension_numbers = #tpu.dot_dimension_numbers<[1], [0], [0], [1], [0, 0, 1, 1], [], []>} : vector<2x128xf32>, vector<128x512xf32>, vector<2x512xf32> -> vector<2x512xf32>
    %c0_3 = arith.constant 0 : index
    %c0_4 = arith.constant 0 : index
    %3 = vector.load %arg2[%c0_3, %c0_4] : memref<2x1xf32, #tpu.memory_space<vmem>>, vector<2x1xf32>
    %c0_5 = arith.constant 0 : index
    %c0_6 = arith.constant 0 : index
    %4 = vector.load %arg4[%c0_5, %c0_6] : memref<1x512xf32, #tpu.memory_space<vmem>>, vector<1x512xf32>
    %5 = vector.broadcast %3 : vector<2x1xf32> to vector<2x512xf32>
    %6 = vector.broadcast %4 : vector<1x512xf32> to vector<2x512xf32>
    %7 = arith.mulf %5, %6 : vector<2x512xf32>
    %8 = arith.addf %2, %7 : vector<2x512xf32>
    %c0_7 = arith.constant 0 : index
    %c0_8 = arith.constant 0 : index
    %9 = vector.load %arg5[%c0_7, %c0_8] : memref<1x512xf32, #tpu.memory_space<vmem>>, vector<1x512xf32>
    %10 = vector.broadcast %9 : vector<1x512xf32> to vector<2x512xf32>
    %11 = arith.addf %8, %10 : vector<2x512xf32>
    %cst_9 = arith.constant 0.000000e+00 : f32
    %12 = vector.broadcast %cst_9 : f32 to vector<2x512xf32>
    %13 = arith.maximumf %11, %12 : vector<2x512xf32>
    %c0_10 = arith.constant 0 : index
    %c0_11 = arith.constant 0 : index
    %14 = vector.load %arg6[%c0_10, %c0_11] : memref<512x256xf32, #tpu.memory_space<vmem>>, vector<512x256xf32>
    %cst_12 = arith.constant dense<0.000000e+00> : vector<2x256xf32>
    %15 = tpu.matmul %13, %14, %cst_12 {dimension_numbers = #tpu.dot_dimension_numbers<[1], [0], [0], [1], [0, 0, 1, 1], [], []>} : vector<2x512xf32>, vector<512x256xf32>, vector<2x256xf32> -> vector<2x256xf32>
    %c0_13 = arith.constant 0 : index
    %c0_14 = arith.constant 0 : index
    %16 = vector.load %arg7[%c0_13, %c0_14] : memref<1x256xf32, #tpu.memory_space<vmem>>, vector<1x256xf32>
    %17 = vector.broadcast %16 : vector<1x256xf32> to vector<2x256xf32>
    %18 = arith.addf %15, %17 : vector<2x256xf32>
    %cst_15 = arith.constant 0.000000e+00 : f32
    %19 = vector.broadcast %cst_15 : f32 to vector<2x256xf32>
    %20 = arith.maximumf %18, %19 : vector<2x256xf32>
    %c0_16 = arith.constant 0 : index
    %c0_17 = arith.constant 0 : index
    %21 = vector.load %arg8[%c0_16, %c0_17] : memref<256x128xf32, #tpu.memory_space<vmem>>, vector<256x128xf32>
    %cst_18 = arith.constant dense<0.000000e+00> : vector<2x128xf32>
    %22 = tpu.matmul %20, %21, %cst_18 {dimension_numbers = #tpu.dot_dimension_numbers<[1], [0], [0], [1], [0, 0, 1, 1], [], []>} : vector<2x256xf32>, vector<256x128xf32>, vector<2x128xf32> -> vector<2x128xf32>
    %c0_19 = arith.constant 0 : index
    %c0_20 = arith.constant 0 : index
    %23 = vector.load %arg9[%c0_19, %c0_20] : memref<1x128xf32, #tpu.memory_space<vmem>>, vector<1x128xf32>
    %24 = vector.broadcast %23 : vector<1x128xf32> to vector<2x128xf32>
    %25 = arith.addf %22, %24 : vector<2x128xf32>
    %c0_21 = arith.constant 0 : index
    %c0_22 = arith.constant 0 : index
    %26 = vector.load %arg10[%c0_21, %c0_22] : memref<2x128xf32, #tpu.memory_space<vmem>>, vector<2x128xf32>
    tpu.vector_store %arg10[%c0_21, %c0_22], %25 {strides = array<i32>} : memref<2x128xf32, #tpu.memory_space<vmem>>, vector<2x128xf32>,
    return
  }
  func.func @transform_0(%arg0: i32) -> (i32, i32) {
    %c0_i32 = arith.constant 0 : i32
    %c0_i32_0 = arith.constant 0 : i32
    return %arg0, %c0_i32 : i32, i32
  }
  func.func @transform_1(%arg0: i32) -> (i32, i32) {
    %c0_i32 = arith.constant 0 : i32
    %c0_i32_0 = arith.constant 0 : i32
    return %arg0, %c0_i32 : i32, i32
  }
  func.func @transform_2(%arg0: i32) -> (i32, i32) {
    %c0_i32 = arith.constant 0 : i32
    %c0_i32_0 = arith.constant 0 : i32
    %c0_i32_1 = arith.constant 0 : i32
    return %c0_i32, %c0_i32_0 : i32, i32
  }
  func.func @transform_3(%arg0: i32) -> (i32, i32) {
    %c0_i32 = arith.constant 0 : i32
    %c0_i32_0 = arith.constant 0 : i32
    %c0_i32_1 = arith.constant 0 : i32
    return %c0_i32, %c0_i32_0 : i32, i32
  }
  func.func @transform_4(%arg0: i32) -> (i32, i32) {
    %c0_i32 = arith.constant 0 : i32
    %c0_i32_0 = arith.constant 0 : i32
    %c0_i32_1 = arith.constant 0 : i32
    return %c0_i32, %c0_i32_0 : i32, i32
  }
  func.func @transform_5(%arg0: i32) -> (i32, i32) {
    %c0_i32 = arith.constant 0 : i32
    %c0_i32_0 = arith.constant 0 : i32
    %c0_i32_1 = arith.constant 0 : i32
    return %c0_i32, %c0_i32_0 : i32, i32
  }
  func.func @transform_6(%arg0: i32) -> (i32, i32) {
    %c0_i32 = arith.constant 0 : i32
    %c0_i32_0 = arith.constant 0 : i32
    %c0_i32_1 = arith.constant 0 : i32
    return %c0_i32, %c0_i32_0 : i32, i32
  }
  func.func @transform_7(%arg0: i32) -> (i32, i32) {
    %c0_i32 = arith.constant 0 : i32
    %c0_i32_0 = arith.constant 0 : i32
    %c0_i32_1 = arith.constant 0 : i32
    return %c0_i32, %c0_i32_0 : i32, i32
  }
  func.func @transform_8(%arg0: i32) -> (i32, i32) {
    %c0_i32 = arith.constant 0 : i32
    %c0_i32_0 = arith.constant 0 : i32
    %c0_i32_1 = arith.constant 0 : i32
    return %c0_i32, %c0_i32_0 : i32, i32
  }
  func.func @transform_9(%arg0: i32) -> (i32, i32) {
    %c0_i32 = arith.constant 0 : i32
    %c0_i32_0 = arith.constant 0 : i32
    return %arg0, %c0_i32 : i32, i32
  }
}

</mosaic_0001>

<bundles_post_ra>
// kernel: tpu_custom_call.1
= control target key start
LH: loop header
LB: loop body
LE: loop exit
PB: predicated region body
PF: predicated region fallthrough
CT: control target
= control target key end

     0   :  { %14 = vsyncpa [#allocation3], 0  ;;  %s1295_s0 = inlined_call_operand.vmem [shape: f32[2,128], index: 0, kind: input, shape index: {}]   ;;  %s1296_s1 = inlined_call_operand.vmem [shape: f32[2,1], index: 1, kind: input, shape index: {}]   ;;  %s1297_s2 = inlined_call_operand.hbm [shape: f32[128,512], index: 2, kind: input, shape index: {}]   ;;  %s1298_s3 = inlined_call_operand.vmem [shape: f32[1,512], index: 3, kind: input, shape index: {}]   ;;  %s1299_s4 = inlined_call_operand.vmem [shape: f32[1,512], index: 4, kind: input, shape index: {}]   ;;  %s1300_s5 = inlined_call_operand.hbm [shape: f32[512,256], index: 5, kind: input, shape index: {}]   ;;  %s1301_s6 = inlined_call_operand.vmem [shape: f32[1,256], index: 6, kind: input, shape index: {}]   ;;  %s1302_s7 = inlined_call_operand.hbm [shape: f32[256,128], index: 7, kind: input, shape index: {}]   ;;  %s1303_s8 = inlined_call_operand.vmem [shape: f32[1,128], index: 8, kind: input, shape index: {}]   ;;  %s1304_s9 = inlined_call_operand.hbm [shape: f32[2,128], index: 9, kind: output, shape index: {}]  }
   0x1   :  { %15 = vsyncpa [#allocation6], 0 }
   0x2   :  { %16 = vsyncpa [#allocation4], 0  ;;  %s1124_s30 = smov [#allocation5]   ;;  %s1030_s13 = scalar_lea.hbm %s1300_s5, 16384 }
   0x3   :  { %s42_s10 = sshll.u32 %s1124_s30, 4  ;;  %p1031_p0 = scmp.ne.s32.totalorder %s1300_s5, %s1030_s13  ;;  %s43_s10 = int_to_ptr.vmem [resolvable:$true] %s42_s10 }
   0x4   :  { %p1034_p1 = scmp.lt.u32.totalorder %s1030_s13, %s1300_s5 }
   0x6   :  { %p1036_p2 = pnand %p1034_p1, %p1031_p0 }
   0x8   :  { %1039 = shalt.err (!%p1036_p2)
}
   0x9   :  { %s1040_s18 = scalar_lea.vmem %s43_s10, 16384  ;;  %p1045_p4 = scmp.lt.s32.totalorder %s43_s10, %s43_s10 }
   0xa   :  { %p1041_p3 = scmp.ne.s32.totalorder %s43_s10, %s1040_s18  ;;  %p1046_p5 = scmp.lt.s32.totalorder %s1040_s18, %s1040_s18 }
   0xc   :  { %p1047_p6 = por %p1046_p5, %p1045_p4 }
   0xe   :  { %p1048_p7 = pnand %p1047_p6, %p1041_p3 }
  0x10   :  { %1051 = shalt.err (!%p1048_p7)
}
  0x11   :  { %s1125_s19 = smov 256   ;;  %s1126_s20 = smov 16  }
  0x12   :  { %48 = dma.hbm_to_vmem [thread:$0]  %s1300_s5, 16384, %s43_s10, [#allocation6], %s1125_s19, %s1125_s19, %s1126_s20  }
  0x13   :  { %s1127_s23 = smov [#allocation2]   ;;  %s1052_s27 = scalar_lea.hbm %s1297_s2, 8192 }
  0x14   :  { %s26_s24 = sshll.u32 %s1127_s23, 4  ;;  %p1053_p8 = scmp.ne.s32.totalorder %s1297_s2, %s1052_s27  ;;  %s27_s24 = int_to_ptr.vmem [resolvable:$true] %s26_s24 }
  0x15   :  { %p1056_p9 = scmp.lt.u32.totalorder %s1052_s27, %s1297_s2 }
  0x17   :  { %p1058_p10 = pnand %p1056_p9, %p1053_p8 }
  0x19   :  { %1061 = shalt.err (!%p1058_p10)
}
  0x1a   :  { %s1062_s12 = scalar_lea.vmem %s27_s24, 8192  ;;  %p1067_p12 = scmp.lt.s32.totalorder %s27_s24, %s27_s24 }
  0x1b   :  { %p1063_p11 = scmp.ne.s32.totalorder %s27_s24, %s1062_s12  ;;  %p1068_p13 = scmp.lt.s32.totalorder %s1062_s12, %s1062_s12 }
  0x1d   :  { %p1069_p0 = por %p1068_p13, %p1067_p12 }
  0x1f   :  { %p1070_p1 = pnand %p1069_p0, %p1063_p11 }
  0x21   :  { %1073 = shalt.err (!%p1070_p1)
}
  0x22   :  { %s1128_s5 = smov 512   ;;  %s1129_s10 = smov 32  }
  0x23   :  { %32 = dma.hbm_to_vmem [thread:$0]  %s1297_s2, 8192, %s27_s24, [#allocation3], %s1128_s5, %s1128_s5, %s1129_s10  }
  0x24   :  { %s1130_s15 = smov [#allocation7]   ;;  %s1074_s19 = scalar_lea.hbm %s1302_s7, 4096 }
  0x25   :  { %s56_s16 = sshll.u32 %s1130_s15, 4  ;;  %p1075_p2 = scmp.ne.s32.totalorder %s1302_s7, %s1074_s19  ;;  %s57_s16 = int_to_ptr.vmem [resolvable:$true] %s56_s16 }
  0x26   :  { %p1078_p3 = scmp.lt.u32.totalorder %s1074_s19, %s1302_s7 }
  0x28   :  { %p1080_p4 = pnand %p1078_p3, %p1075_p2 }
  0x2a   :  { %1083 = shalt.err (!%p1080_p4)
}
  0x2b   :  { %s1084_s25 = scalar_lea.vmem %s57_s16, 4096  ;;  %p1089_p6 = scmp.lt.s32.totalorder %s57_s16, %s57_s16 }
  0x2c   :  { %p1085_p5 = scmp.ne.s32.totalorder %s57_s16, %s1084_s25  ;;  %p1090_p7 = scmp.lt.s32.totalorder %s1084_s25, %s1084_s25 }
  0x2e   :  { %p1091_p8 = por %p1090_p7, %p1089_p6 }
  0x30   :  { %p1092_p9 = pnand %p1091_p8, %p1085_p5 }
  0x32   :  { %1095 = shalt.err (!%p1092_p9)
}
  0x33   :  { %s1131_s2 = smov 128   ;;  %s1132_s24 = smov 8  }
  0x34   :  { %62 = dma.hbm_to_vmem [thread:$0]  %s1302_s7, 4096, %s57_s16, [#allocation6], %s1131_s2, %s1131_s2, %s1132_s24  }
  0x35   :  { %1118 = dma.done.wait [#allocation3], 8192  }
  0x36   :  { %1119 = vsyncadd [#allocation3], 4294959104 }
  0x37   :  { %1120 = dma.done.wait [#allocation6], 20480  }
  0x38   :  { %1121 = vsyncadd [#allocation6], 4294946816  ;;  %v1133_v0 = vmov 0.0   ;;  %v1134_v1 = vmov 0   ;;  %v76_v2 = vld [vmem:[#allocation2 + $0x8] sm:$0xff]  ;;  %v75_v4 = vld [vmem:[#allocation2] sm:$0xff] }
  0x39   :  { %235 = vmatprep.mubr.f32.mxu1 %v1133_v0  ;;  %1029 = vset.pattern.permute.xlu0 %v1134_v1  ;;  %v80_v3 = vld [vmem:[#allocation2 + $0x28] sm:$0xff]  ;;  %v79_v6 = vld [vmem:[#allocation2 + $0x20] sm:$0xff]  ;;  %v346_v47 = vld [vmem:[#allocation5 + $0x18] sm:$0xff]  ;;  %s1135_s13 = smov [#allocation8]  }
  0x3a   :  { %v789_v5 = vpack.c.bf16 %v80_v3, %v76_v2  ;;  %v84_v7 = vld [vmem:[#allocation2 + $0x48] sm:$0xff]  ;;  %v791_v9 = vpack.c.bf16 %v79_v6, %v75_v4  ;;  %v83_v11 = vld [vmem:[#allocation2 + $0x40] sm:$0xff]  ;;  %v345_v50 = vld [vmem:[#allocation5 + $0x10] sm:$0xff] }
  0x3b   :  { %v88_v8 = vld [vmem:[#allocation2 + $0x68] sm:$0xff]  ;;  %v87_v12 = vld [vmem:[#allocation2 + $0x60] sm:$0xff]  ;;  %v350_v52 = vld [vmem:[#allocation5 + $0x38] sm:$0xff] }
  0x3c   :  { %v793_v10 = vpack.c.bf16 %v88_v8, %v84_v7  ;;  %v92_v13 = vld [vmem:[#allocation2 + $0x88] sm:$0xff]  ;;  %790 = vmatprep.subr.bf16.mxu1 %v789_v5  ;;  %v795_v15 = vpack.c.bf16 %v87_v12, %v83_v11  ;;  %v91_v17 = vld [vmem:[#allocation2 + $0x80] sm:$0xff]  ;;  %v349_v57 = vld [vmem:[#allocation5 + $0x30] sm:$0xff] }
  0x3d   :  { %v96_v14 = vld [vmem:[#allocation2 + $0xa8] sm:$0xff]  ;;  %792 = vmatpush1.bf16.msra.mxu1 %v791_v9  ;;  %v95_v18 = vld [vmem:[#allocation2 + $0xa0] sm:$0xff]  ;;  %v354_v62 = vld [vmem:[#allocation5 + $0x58] sm:$0xff] }
  0x3e   :  { %794 = vmatprep.subr.bf16.mxu1 %v793_v10  ;;  %v797_v16 = vpack.c.bf16 %v96_v14, %v92_v13  ;;  %v100_v19 = vld [vmem:[#allocation2 + $0xc8] sm:$0xff]  ;;  %v799_v21 = vpack.c.bf16 %v95_v18, %v91_v17  ;;  %v99_v23 = vld [vmem:[#allocation2 + $0xc0] sm:$0xff]  ;;  %v78_v63 = vld [vmem:[#allocation2 + $0x18] sm:$0xff] }
  0x3f   :  { %v104_v20 = vld [vmem:[#allocation2 + $0xe8] sm:$0xff]  ;;  %v103_v24 = vld [vmem:[#allocation2 + $0xe0] sm:$0xff]  ;;  %v82_v1 = vld [vmem:[#allocation2 + $0x38] sm:$0xff] }
  0x40   :  { %v801_v22 = vpack.c.bf16 %v104_v20, %v100_v19  ;;  %v108_v25 = vld [vmem:[#allocation2 + $0x108] sm:$0xff]  ;;  %v803_v27 = vpack.c.bf16 %v103_v24, %v99_v23  ;;  %v107_v29 = vld [vmem:[#allocation2 + $0x100] sm:$0xff]  ;;  %v353_v5 = vld [vmem:[#allocation5 + $0x50] sm:$0xff]  ;;  %v821_v9 = vpack.c.bf16 %v82_v1, %v78_v63 }
  0x41   :  { %796 = vmatpush1.bf16.msra.mxu1 %v795_v15  ;;  %v112_v26 = vld [vmem:[#allocation2 + $0x128] sm:$0xff]  ;;  %v111_v30 = vld [vmem:[#allocation2 + $0x120] sm:$0xff]  ;;  %v358_v8 = vld [vmem:[#allocation5 + $0x78] sm:$0xff] }
  0x42   :  { %798 = vmatprep.subr.bf16.mxu1 %v797_v16  ;;  %v805_v28 = vpack.c.bf16 %v112_v26, %v108_v25  ;;  %v116_v31 = vld [vmem:[#allocation2 + $0x148] sm:$0xff]  ;;  %v807_v33 = vpack.c.bf16 %v111_v30, %v107_v29  ;;  %v115_v35 = vld [vmem:[#allocation2 + $0x140] sm:$0xff]  ;;  %v77_v10 = vld [vmem:[#allocation2 + $0x10] sm:$0xff] }
  0x43   :  { %v120_v32 = vld [vmem:[#allocation2 + $0x168] sm:$0xff]  ;;  %v119_v36 = vld [vmem:[#allocation2 + $0x160] sm:$0xff]  ;;  %v81_v11 = vld [vmem:[#allocation2 + $0x30] sm:$0xff] }
  0x44   :  { %v809_v34 = vpack.c.bf16 %v120_v32, %v116_v31  ;;  %v124_v37 = vld [vmem:[#allocation2 + $0x188] sm:$0xff]  ;;  %v811_v39 = vpack.c.bf16 %v119_v36, %v115_v35  ;;  %v123_v40 = vld [vmem:[#allocation2 + $0x180] sm:$0xff]  ;;  %v86_v12 = vld [vmem:[#allocation2 + $0x58] sm:$0xff]  ;;  %v823_v19 = vpack.c.bf16 %v81_v11, %v77_v10 }
  0x45   :  { %800 = vmatpush1.bf16.msra.mxu1 %v799_v21  ;;  %v128_v38 = vld [vmem:[#allocation2 + $0x1a8] sm:$0xff]  ;;  %v127_v41 = vld [vmem:[#allocation2 + $0x1a0] sm:$0xff]  ;;  %v90_v13 = vld [vmem:[#allocation2 + $0x78] sm:$0xff] }
  0x46   :  { %802 = vmatprep.subr.bf16.mxu1 %v801_v22  ;;  %v813_v42 = vpack.c.bf16 %v128_v38, %v124_v37  ;;  %v132_v43 = vld [vmem:[#allocation2 + $0x1c8] sm:$0xff]  ;;  %v139_v45 = vld [vmem:[%s1296_s1] sm:$0x3]  ;;  %v815_v53 = vpack.c.bf16 %v127_v41, %v123_v40  ;;  %v357_v17 = vld [vmem:[#allocation5 + $0x70] sm:$0xff]  ;;  %v825_v22 = vpack.c.bf16 %v90_v13, %v86_v12 }
  0x47   :  { %v136_v44 = vld [vmem:[#allocation2 + $0x1e8] sm:$0xff]  ;;  %143 = vperm.xlu0 %1029, %v139_v45   ;;  %v343_v48 = vld [vmem:[#allocation5] sm:$0xff]  ;;  %v362_v21 = vld [vmem:[#allocation5 + $0x98] sm:$0xff] }
  0x48   :  { %v344_v46 = vld [vmem:[#allocation5 + $0x8] sm:$0xff]  ;;  %v855_v54 = vpack.c.bf16 %v345_v50, %v343_v48  ;;  %v347_v56 = vld [vmem:[#allocation5 + $0x20] sm:$0xff]  ;;  %v817_v59 = vpack.c.bf16 %v136_v44, %v132_v43  ;;  %v85_v23 = vld [vmem:[#allocation2 + $0x50] sm:$0xff] }
  0x49   :  { %804 = vmatpush1.bf16.msra.mxu1 %v803_v27  ;;  %v853_v49 = vpack.c.bf16 %v346_v47, %v344_v46  ;;  %v348_v51 = vld [vmem:[#allocation5 + $0x28] sm:$0xff]  ;;  %v131_v60 = vld [vmem:[#allocation2 + $0x1c0] sm:$0xff]  ;;  %v859_v2 = vpack.c.bf16 %v349_v57, %v347_v56  ;;  %v89_v24 = vld [vmem:[#allocation2 + $0x70] sm:$0xff] }
  0x4a   :  { %806 = vmatprep.subr.bf16.mxu1 %v805_v28  ;;  %v857_v55 = vpack.c.bf16 %v350_v52, %v348_v51  ;;  %v352_v58 = vld [vmem:[#allocation5 + $0x48] sm:$0xff]  ;;  %v135_v61 = vld [vmem:[#allocation2 + $0x1e0] sm:$0xff]  ;;  %v94_v25 = vld [vmem:[#allocation2 + $0x98] sm:$0xff]  ;;  %v827_v31 = vpack.c.bf16 %v89_v24, %v85_v23 }
  0x4b   :  { %854 = vmatprep.subr.bf16.mxu0 %v853_v49  ;;  %v861_v3 = vpack.c.bf16 %v354_v62, %v352_v58  ;;  %v351_v4 = vld [vmem:[#allocation5 + $0x40] sm:$0xff]  ;;  %v819_v6 = vpack.c.bf16 %v135_v61, %v131_v60  ;;  %v356_v7 = vld [vmem:[#allocation5 + $0x68] sm:$0xff]  ;;  %v98_v26 = vld [vmem:[#allocation2 + $0xb8] sm:$0xff] }
  0x4c   :  { %856 = vmatpush1.bf16.msra.mxu0 %v855_v54  ;;  %v863_v14 = vpack.c.bf16 %v353_v5, %v351_v4  ;;  %v865_v15 = vpack.c.bf16 %v358_v8, %v356_v7  ;;  %v355_v16 = vld [vmem:[#allocation5 + $0x60] sm:$0xff]  ;;  %v360_v20 = vld [vmem:[#allocation5 + $0x88] sm:$0xff]  ;;  %v361_v30 = vld [vmem:[#allocation5 + $0x90] sm:$0xff] }
  0x4d   :  { %808 = vmatpush1.bf16.msra.mxu1 %v807_v33  ;;  %858 = vmatprep.subr.bf16.mxu0 %v857_v55  ;;  %v1229_v18 = vld [vmem:[%s1295_s0] sm:$0x3]  ;;  %v867_v27 = vpack.c.bf16 %v357_v17, %v355_v16  ;;  %v869_v28 = vpack.c.bf16 %v362_v21, %v360_v20  ;;  %v364_v32 = vld [vmem:[#allocation5 + $0xa8] sm:$0xff]  ;;  %v366_v33 = vld [vmem:[#allocation5 + $0xb8] sm:$0xff] }
  0x4e   :  { %810 = vmatprep.subr.bf16.mxu1 %v809_v34  ;;  %v359_v29 = vld [vmem:[#allocation5 + $0x80] sm:$0xff]  ;;  %v829_v34 = vpack.c.bf16 %v98_v26, %v94_v25  ;;  %v93_v35 = vld [vmem:[#allocation2 + $0x90] sm:$0xff]  ;;  %v102_v37 = vld [vmem:[#allocation2 + $0xd8] sm:$0xff]  ;;  %v873_v40 = vpack.c.bf16 %v366_v33, %v364_v32 }
  0x4f   :  { %v97_v36 = vld [vmem:[#allocation2 + $0xb0] sm:$0xff]  ;;  %v106_v38 = vld [vmem:[#allocation2 + $0xf8] sm:$0xff]  ;;  %v363_v41 = vld [vmem:[#allocation5 + $0xa0] sm:$0xff] }
  0x50   :  { %860 = vmatpush1.bf16.msra.mxu0 %v859_v2  ;;  %v831_v43 = vpack.c.bf16 %v97_v36, %v93_v35  ;;  %v368_v44 = vld [vmem:[#allocation5 + $0xc8] sm:$0xff]  ;;  %v370_v45 = vld [vmem:[#allocation5 + $0xd8] sm:$0xff]  ;;  %v101_v46 = vld [vmem:[#allocation2 + $0xd0] sm:$0xff] }
  0x51   :  { %812 = vmatpush1.bf16.msra.mxu1 %v811_v39  ;;  %862 = vmatprep.subr.bf16.mxu0 %v861_v3  ;;  %v871_v39 = vpack.c.bf16 %v361_v30, %v359_v29  ;;  %v105_v47 = vld [vmem:[#allocation2 + $0xf0] sm:$0xff]  ;;  %v110_v48 = vld [vmem:[#allocation2 + $0x118] sm:$0xff]  ;;  %v877_v51 = vpack.c.bf16 %v370_v45, %v368_v44  ;;  %v367_v52 = vld [vmem:[#allocation5 + $0xc0] sm:$0xff] }
  0x52   :  { %814 = vmatprep.subr.bf16.mxu1 %v813_v42  ;;  %v365_v42 = vld [vmem:[#allocation5 + $0xb0] sm:$0xff]  ;;  %v114_v49 = vld [vmem:[#allocation2 + $0x138] sm:$0xff]  ;;  %v835_v54 = vpack.c.bf16 %v105_v47, %v101_v46  ;;  %v372_v55 = vld [vmem:[#allocation5 + $0xe8] sm:$0xff] }
  0x53   :  { %v875_v50 = vpack.c.bf16 %v365_v42, %v363_v41  ;;  %v374_v56 = vld [vmem:[#allocation5 + $0xf8] sm:$0xff]  ;;  %v837_v57 = vpack.c.bf16 %v114_v49, %v110_v48  ;;  %v109_v58 = vld [vmem:[#allocation2 + $0x110] sm:$0xff]  ;;  %v371_v1 = vld [vmem:[#allocation5 + $0xe0] sm:$0xff] }
  0x54   :  { %864 = vmatpush1.bf16.msra.mxu0 %v863_v14  ;;  %v118_v60 = vld [vmem:[#allocation2 + $0x158] sm:$0xff]  ;;  %v881_v63 = vpack.c.bf16 %v374_v56, %v372_v55  ;;  %v373_v2 = vld [vmem:[#allocation5 + $0xf0] sm:$0xff]  ;;  %v376_v4 = vld [vmem:[#allocation5 + $0x108] sm:$0xff] }
  0x55   :  { %816 = vmatpush1.bf16.msra.mxu1 %v815_v53  ;;  %866 = vmatprep.subr.bf16.mxu0 %v865_v15  ;;  %v369_v53 = vld [vmem:[#allocation5 + $0xd0] sm:$0xff]  ;;  %v122_v61 = vld [vmem:[#allocation2 + $0x178] sm:$0xff]  ;;  %v883_v11 = vpack.c.bf16 %v373_v2, %v371_v1  ;;  %v375_v13 = vld [vmem:[#allocation5 + $0x100] sm:$0xff] }
  0x56   :  { %818 = vmatprep.subr.bf16.mxu1 %v817_v59  ;;  %v113_v59 = vld [vmem:[#allocation2 + $0x130] sm:$0xff]  ;;  %v879_v62 = vpack.c.bf16 %v369_v53, %v367_v52  ;;  %v378_v5 = vld [vmem:[#allocation5 + $0x118] sm:$0xff]  ;;  %v380_v16 = vld [vmem:[#allocation5 + $0x128] sm:$0xff] }
  0x57   :  { %v839_v3 = vpack.c.bf16 %v113_v59, %v109_v58  ;;  %v117_v7 = vld [vmem:[#allocation2 + $0x150] sm:$0xff]  ;;  %v130_v10 = vld [vmem:[#allocation2 + $0x1b8] sm:$0xff]  ;;  %v885_v12 = vpack.c.bf16 %v378_v5, %v376_v4  ;;  %v379_v26 = vld [vmem:[#allocation5 + $0x120] sm:$0xff] }
  0x58   :  { %868 = vmatpush1.bf16.msra.mxu0 %v867_v27  ;;  %v121_v8 = vld [vmem:[#allocation2 + $0x170] sm:$0xff]  ;;  %v382_v17 = vld [vmem:[#allocation5 + $0x138] sm:$0xff]  ;;  %v384_v29 = vld [vmem:[#allocation5 + $0x148] sm:$0xff] }
  0x59   :  { %820 = vmatpush1.bf16.msra.mxu1 %v819_v6  ;;  %870 = vmatprep.subr.bf16.mxu0 %v869_v28  ;;  %v841_v6 = vpack.c.bf16 %v122_v61, %v118_v60  ;;  %v377_v14 = vld [vmem:[#allocation5 + $0x110] sm:$0xff]  ;;  %v843_v15 = vpack.c.bf16 %v121_v8, %v117_v7  ;;  %v138_v23 = vld [vmem:[#allocation2 + $0x1f8] sm:$0xff]  ;;  %v889_v25 = vpack.c.bf16 %v382_v17, %v380_v16  ;;  %v383_v36 = vld [vmem:[#allocation5 + $0x140] sm:$0xff] }
  0x5a   :  { %822 = vmatprep.subr.bf16.mxu1 %v821_v9  ;;  %v126_v9 = vld [vmem:[#allocation2 + $0x198] sm:$0xff]  ;;  %v125_v20 = vld [vmem:[#allocation2 + $0x190] sm:$0xff]  ;;  %v887_v24 = vpack.c.bf16 %v377_v14, %v375_v13  ;;  %v392_v45 = vld [vmem:[#allocation5 + $0x188] sm:$0xff] }
  0x5b   :  { %v129_v21 = vld [vmem:[#allocation2 + $0x1b0] sm:$0xff]  ;;  %v386_v30 = vld [vmem:[#allocation5 + $0x158] sm:$0xff]  ;;  %v391_v48 = vld [vmem:[#allocation5 + $0x180] sm:$0xff] }
  0x5c   :  { %236 = vmatmul.mubr.f32.vlgmr.msra.gmra.mrb[0].mxu1 %v1229_v18  ;;  %872 = vmatpush1.bf16.msra.mxu0 %v871_v39  ;;  %v381_v27 = vld [vmem:[#allocation5 + $0x130] sm:$0xff]  ;;  %v847_v28 = vpack.c.bf16 %v129_v21, %v125_v20  ;;  %v893_v35 = vpack.c.bf16 %v386_v30, %v384_v29  ;;  %v388_v39 = vld [vmem:[#allocation5 + $0x168] sm:$0xff]  ;;  %v402_v58 = vld [vmem:[#allocation5 + $0x1d8] sm:$0xff] }
  0x5d   :  { %824 = vmatpush1.bf16.msra.mxu1 %v823_v19  ;;  %306 = vmatprep.mubr.f32.mxu1 %v1133_v0  ;;  %v833_v0 = vpack.c.bf16 %v106_v38, %v102_v37  ;;  %v845_v19 = vpack.c.bf16 %v130_v10, %v126_v9  ;;  %v133_v32 = vld [vmem:[#allocation2 + $0x1d0] sm:$0xff]  ;;  %v403_v2 = vld [vmem:[#allocation5 + $0x1e0] sm:$0xff]  ;;  %v408_v5 = vld [vmem:[#allocation5 + $0x208] sm:$0xff] }
  0x5e   :  { %826 = vmatprep.subr.bf16.mxu1 %v825_v22  ;;  %874 = vmatprep.subr.bf16.mxu0 %v873_v40  ;;  %v134_v22 = vld [vmem:[#allocation2 + $0x1d8] sm:$0xff]  ;;  %v137_v33 = vld [vmem:[#allocation2 + $0x1f0] sm:$0xff]  ;;  %v643_v8 = vld [vmem:[#allocation7 + $0x80] sm:$0xff] }
  0x5f   :  { %v385_v37 = vld [vmem:[#allocation5 + $0x150] sm:$0xff]  ;;  %v851_v38 = vpack.c.bf16 %v137_v33, %v133_v32  ;;  %v390_v40 = vld [vmem:[#allocation5 + $0x178] sm:$0xff]  ;;  %v644_v9 = vld [vmem:[#allocation7 + $0x88] sm:$0xff] }
  0x60   :  { %876 = vmatpush1.bf16.msra.mxu0 %v875_v50  ;;  %v895_v41 = vpack.c.bf16 %v385_v37, %v383_v36  ;;  %v897_v42 = vpack.c.bf16 %v390_v40, %v388_v39  ;;  %v389_v44 = vld [vmem:[#allocation5 + $0x170] sm:$0xff]  ;;  %v396_v50 = vld [vmem:[#allocation5 + $0x1a8] sm:$0xff]  ;;  %v627_v10 = vld [vmem:[#allocation7] sm:$0xff] }
  0x61   :  { %828 = vmatpush1.bf16.msra.mxu1 %v827_v31  ;;  %878 = vmatprep.subr.bf16.mxu0 %v877_v51  ;;  %v849_v31 = vpack.c.bf16 %v138_v23, %v134_v22  ;;  %v393_v49 = vld [vmem:[#allocation5 + $0x190] sm:$0xff]  ;;  %v398_v51 = vld [vmem:[#allocation5 + $0x1b8] sm:$0xff]  ;;  %v647_v20 = vld [vmem:[#allocation7 + $0xa0] sm:$0xff] }
  0x62   :  { %830 = vmatprep.subr.bf16.mxu1 %v829_v34  ;;  %v891_v34 = vpack.c.bf16 %v381_v27, %v379_v26  ;;  %v903_v52 = vpack.c.bf16 %v393_v49, %v391_v48  ;;  %v905_v53 = vpack.c.bf16 %v398_v51, %v396_v50  ;;  %v397_v55 = vld [vmem:[#allocation5 + $0x1b0] sm:$0xff]  ;;  %v646_v14 = vld [vmem:[#allocation7 + $0x98] sm:$0xff]  ;;  %v648_v21 = vld [vmem:[#allocation7 + $0xa8] sm:$0xff] }
  0x63   :  { %v401_v60 = vld [vmem:[#allocation5 + $0x1d0] sm:$0xff]  ;;  %v989_v23 = vpack.c.bf16 %v648_v21, %v647_v20  ;;  %v650_v27 = vld [vmem:[#allocation7 + $0xb8] sm:$0xff]  ;;  %v651_v32 = vld [vmem:[#allocation7 + $0xc0] sm:$0xff] }
  0x64   :  { %880 = vmatpush1.bf16.msra.mxu0 %v879_v62  ;;  %v404_v62 = vld [vmem:[#allocation5 + $0x1e8] sm:$0xff]  ;;  %v645_v13 = vld [vmem:[#allocation7 + $0x90] sm:$0xff]  ;;  %v635_v36 = vld [vmem:[#allocation7 + $0x40] sm:$0xff] }
  0x65   :  { %832 = vmatpush1.bf16.msra.mxu1 %v831_v43  ;;  %882 = vmatprep.subr.bf16.mxu0 %v881_v63  ;;  %v387_v43 = vld [vmem:[#allocation5 + $0x160] sm:$0xff]  ;;  %v406_v63 = vld [vmem:[#allocation5 + $0x1f8] sm:$0xff]  ;;  %v985_v16 = vpack.c.bf16 %v646_v14, %v645_v13  ;;  %v629_v17 = vld [vmem:[#allocation7 + $0x10] sm:$0xff] }
  0x66   :  { %834 = vmatprep.subr.bf16.mxu1 %v833_v0  ;;  %v394_v0 = vld [vmem:[#allocation5 + $0x198] sm:$0xff]  ;;  %v899_v46 = vpack.c.bf16 %v389_v44, %v387_v43  ;;  %v913_v1 = vpack.c.bf16 %v406_v63, %v404_v62  ;;  %v649_v26 = vld [vmem:[#allocation7 + $0xb0] sm:$0xff]  ;;  %v652_v33 = vld [vmem:[#allocation7 + $0xc8] sm:$0xff] }
  0x67   :  { %v901_v47 = vpack.c.bf16 %v394_v0, %v392_v45  ;;  %v993_v29 = vpack.c.bf16 %v650_v27, %v649_v26  ;;  %v633_v30 = vld [vmem:[#allocation7 + $0x30] sm:$0xff]  ;;  %v636_v37 = vld [vmem:[#allocation7 + $0x48] sm:$0xff]  ;;  %v654_v39 = vld [vmem:[#allocation7 + $0xd8] sm:$0xff] }
  0x68   :  { %884 = vmatpush1.bf16.msra.mxu0 %v883_v11  ;;  %v981_v11 = vpack.c.bf16 %v644_v9, %v643_v8  ;;  %v999_v40 = vpack.c.bf16 %v636_v37, %v635_v36  ;;  %v638_v43 = vld [vmem:[#allocation7 + $0x58] sm:$0xff]  ;;  %v655_v44 = vld [vmem:[#allocation7 + $0xe0] sm:$0xff]  ;;  %v656_v45 = vld [vmem:[#allocation7 + $0xe8] sm:$0xff] }
  0x69   :  { %836 = vmatpush1.bf16.msra.mxu1 %v835_v54  ;;  %886 = vmatprep.subr.bf16.mxu0 %v885_v12  ;;  %v395_v54 = vld [vmem:[#allocation5 + $0x1a0] sm:$0xff]  ;;  %v628_v12 = vld [vmem:[#allocation7 + $0x8] sm:$0xff]  ;;  %v418_v13 = vld [vmem:[#allocation5 + $0x258] sm:$0xff] }
  0x6a   :  { %838 = vmatprep.subr.bf16.mxu1 %v837_v57  ;;  %v907_v56 = vpack.c.bf16 %v397_v55, %v395_v54  ;;  %v400_v57 = vld [vmem:[#allocation5 + $0x1c8] sm:$0xff]  ;;  %v1242_v50 = vld [vmem:[%s1298_s3] sm:$0xf]  ;;  %v422_v20 = vld [vmem:[#allocation5 + $0x278] sm:$0xff] }
  0x6b   :  { %v909_v59 = vpack.c.bf16 %v402_v58, %v400_v57  ;;  %v1256_v55 = vld [vmem:[%s1299_s4] sm:$0xf]  ;;  %v426_v26 = vld [vmem:[#allocation5 + $0x298] sm:$0xff]  ;;  %v429_v36 = vld [vmem:[#allocation5 + $0x2b0] sm:$0xff] }
  0x6c   :  { %888 = vmatpush1.bf16.msra.mxu0 %v887_v24  ;;  %v631_v24 = vld [vmem:[#allocation7 + $0x20] sm:$0xff] }
  0x6d   :  { %840 = vmatpush1.bf16.msra.mxu1 %v839_v3  ;;  %890 = vmatprep.subr.bf16.mxu0 %v889_v25  ;;  %v405_v3 = vld [vmem:[#allocation5 + $0x1f0] sm:$0xff]  ;;  %v632_v25 = vld [vmem:[#allocation7 + $0x28] sm:$0xff] }
  0x6e   :  { %842 = vmatprep.subr.bf16.mxu1 %v841_v6  ;;  %v915_v4 = vpack.c.bf16 %v405_v3, %v403_v2  ;;  %v410_v6 = vld [vmem:[#allocation5 + $0x218] sm:$0xff]  ;;  %v409_v2 = vld [vmem:[#allocation5 + $0x210] sm:$0xff] }
  0x6f   :  { %v917_v7 = vpack.c.bf16 %v410_v6, %v408_v5  ;;  %v414_v5 = vld [vmem:[#allocation5 + $0x238] sm:$0xff] }
  0x70   :  { %892 = vmatpush1.bf16.msra.mxu0 %v891_v34 }
  0x71   :  { %844 = vmatpush1.bf16.msra.mxu1 %v843_v15  ;;  %894 = vmatprep.subr.bf16.mxu0 %v893_v35  ;;  %v983_v15 = vpack.c.bf16 %v628_v12, %v627_v10  ;;  %v997_v35 = vpack.c.bf16 %v652_v33, %v651_v32  ;;  %v411_v10 = vld [vmem:[#allocation5 + $0x220] sm:$0xff]  ;;  %v416_v12 = vld [vmem:[#allocation5 + $0x248] sm:$0xff]  ;;  %v430_v32 = vld [vmem:[#allocation5 + $0x2b8] sm:$0xff] }
  0x72   :  { %846 = vmatprep.subr.bf16.mxu1 %v845_v19  ;;  %v630_v19 = vld [vmem:[#allocation7 + $0x18] sm:$0xff] }
  0x73   :  { %v987_v22 = vpack.c.bf16 %v630_v19, %v629_v17  ;;  %v417_v17 = vld [vmem:[#allocation5 + $0x250] sm:$0xff]  ;;  %v420_v19 = vld [vmem:[#allocation5 + $0x268] sm:$0xff] }
  0x74   :  { %896 = vmatpush1.bf16.msra.mxu0 %v895_v41 }
  0x75   :  { %848 = vmatpush1.bf16.msra.mxu1 %v847_v28  ;;  %898 = vmatprep.subr.bf16.mxu0 %v897_v42  ;;  %v991_v28 = vpack.c.bf16 %v632_v25, %v631_v24  ;;  %v637_v42 = vld [vmem:[#allocation7 + $0x50] sm:$0xff]  ;;  %v424_v25 = vld [vmem:[#allocation5 + $0x288] sm:$0xff] }
  0x76   :  { %850 = vmatprep.subr.bf16.mxu1 %v849_v31  ;;  %v634_v31 = vld [vmem:[#allocation7 + $0x38] sm:$0xff]  ;;  %v1003_v0 = vpack.c.bf16 %v638_v43, %v637_v42  ;;  %v421_v24 = vld [vmem:[#allocation5 + $0x270] sm:$0xff] }
  0x77   :  { %v995_v34 = vpack.c.bf16 %v634_v31, %v633_v30  ;;  %v425_v30 = vld [vmem:[#allocation5 + $0x290] sm:$0xff]  ;;  %v428_v31 = vld [vmem:[#allocation5 + $0x2a8] sm:$0xff] }
  0x78   :  { %900 = vmatpush1.bf16.msra.mxu0 %v899_v46  ;;  %v1005_v46 = vpack.c.bf16 %v656_v45, %v655_v44  ;;  %v431_v44 = vld [vmem:[#allocation5 + $0x2c0] sm:$0xff]  ;;  %v433_v45 = vld [vmem:[#allocation5 + $0x2d0] sm:$0xff] }
  0x79   :  { %852 = vmatpush1.bf16.msra.mxu1 %v851_v38  ;;  %902 = vmatprep.subr.bf16.mxu0 %v901_v47  ;;  %v653_v38 = vld [vmem:[#allocation7 + $0xd0] sm:$0xff]  ;;  %v147_v47 = vlaneseq }
  0x7a   :  { %982 = vmatprep.subr.bf16.mxu1 %v981_v11  ;;  %v1001_v41 = vpack.c.bf16 %v654_v39, %v653_v38  ;;  %v413_v11 = vld [vmem:[#allocation5 + $0x230] sm:$0xff]  ;;  %v432_v38 = vld [vmem:[#allocation5 + $0x2c8] sm:$0xff]  ;;  %v434_v39 = vld [vmem:[#allocation5 + $0x2d8] sm:$0xff] }
  0x7b   :  { %v1234_v48 = vshrl.u32 %v147_v47, 7  ;;  %v923_v14 = vpack.c.bf16 %v413_v11, %v411_v10  ;;  %v941_v43 = vpack.c.bf16 %v434_v39, %v432_v38  ;;  %v438_v47 = vld [vmem:[#allocation5 + $0x2f8] sm:$0xff]  ;;  %v443_v11 = vld [vmem:[#allocation5 + $0x320] sm:$0xff]  ;;  %v464_v38 = vld [vmem:[#allocation5 + $0x3c8] sm:$0xff] }
  0x7c   :  { %307 = vmatmul.mubr.f32.vlgmr.msra.gmra.mrb[2].mxu1 %v1229_v18  ;;  %904 = vmatpush1.bf16.msra.mxu0 %v903_v52  ;;  %v399_v18 = vld [vmem:[#allocation5 + $0x1c0] sm:$0xff]  ;;  %v466_v39 = vld [vmem:[#allocation5 + $0x3d8] sm:$0xff] }
  0x7d   :  { %906 = vmatprep.subr.bf16.mxu0 %v905_v53  ;;  %v911_v61 = vpack.c.bf16 %v401_v60, %v399_v18  ;;  %984 = vmatpush3.bf16.msra.mxu1 %v983_v15  ;;  %v1237_v49 = vsub.s32 0, %v1234_v48  ;;  %v1245_v51 = vsub.s32 1, %v1234_v48  ;;  %v925_v15 = vpack.c.bf16 %v418_v13, %v416_v12  ;;  %v445_v12 = vld [vmem:[#allocation5 + $0x330] sm:$0xff]  ;;  %v448_v13 = vld [vmem:[#allocation5 + $0x348] sm:$0xff] }
  0x7e   :  { %986 = vmatprep.subr.bf16.mxu1 %v985_v16  ;;  %v415_v16 = vld [vmem:[#allocation5 + $0x240] sm:$0xff]  ;;  %v157_v37 = vsub.s32 2, %v1234_v48 }
  0x7f   :  { %v150_v52 = vrot.slane %v1242_v50, %v1237_v49  ;;  %v154_v54 = vrot.slane %v1242_v50, %v1245_v51  ;;  %v318_v58 = vrot.slane %v1256_v55, %v1237_v49  ;;  %v322_v18 = vrot.slane %v1256_v55, %v1245_v51 }
  0x80   :  { %908 = vmatpush1.bf16.msra.mxu0 %v907_v56  ;;  %v927_v21 = vpack.c.bf16 %v417_v17, %v415_v16  ;;  %v158_v42 = vrot.slane %v1242_v50, %v157_v37  ;;  %v447_v17 = vld [vmem:[#allocation5 + $0x340] sm:$0xff] }
  0x81   :  { %910 = vmatprep.subr.bf16.mxu0 %v909_v59  ;;  %988 = vmatpush3.bf16.msra.mxu1 %v987_v22  ;;  %v929_v22 = vpack.c.bf16 %v422_v20, %v420_v19  ;;  %v449_v19 = vld [vmem:[#allocation5 + $0x350] sm:$0xff]  ;;  %v452_v20 = vld [vmem:[#allocation5 + $0x368] sm:$0xff] }
  0x82   :  { %990 = vmatprep.subr.bf16.mxu1 %v989_v23  ;;  %v419_v23 = vld [vmem:[#allocation5 + $0x260] sm:$0xff] }
  0x83   :  { %v931_v27 = vpack.c.bf16 %v421_v24, %v419_v23  ;;  %v451_v24 = vld [vmem:[#allocation5 + $0x360] sm:$0xff] }
  0x84   :  { %912 = vmatpush1.bf16.msra.mxu0 %v911_v61 }
  0x85   :  { %914 = vmatprep.subr.bf16.mxu0 %v913_v1  ;;  %992 = vmatpush3.bf16.msra.mxu1 %v991_v28  ;;  %v407_v1 = vld [vmem:[#allocation5 + $0x200] sm:$0xff]  ;;  %v933_v28 = vpack.c.bf16 %v426_v26, %v424_v25  ;;  %v453_v25 = vld [vmem:[#allocation5 + $0x370] sm:$0xff]  ;;  %v456_v26 = vld [vmem:[#allocation5 + $0x388] sm:$0xff] }
  0x86   :  { %994 = vmatprep.subr.bf16.mxu1 %v993_v29  ;;  %v423_v29 = vld [vmem:[#allocation5 + $0x280] sm:$0xff] }
  0x87   :  { %v935_v33 = vpack.c.bf16 %v425_v30, %v423_v29  ;;  %v455_v30 = vld [vmem:[#allocation5 + $0x380] sm:$0xff] }
  0x88   :  { %916 = vmatpush1.bf16.msra.mxu0 %v915_v4  ;;  %v412_v4 = vld [vmem:[#allocation5 + $0x228] sm:$0xff] }
  0x89   :  { %918 = vmatprep.subr.bf16.mxu0 %v917_v7  ;;  %996 = vmatpush3.bf16.msra.mxu1 %v995_v34  ;;  %v919_v7 = vpack.c.bf16 %v409_v2, %v407_v1  ;;  %v921_v9 = vpack.c.bf16 %v414_v5, %v412_v4  ;;  %v937_v34 = vpack.c.bf16 %v430_v32, %v428_v31  ;;  %v439_v5 = vld [vmem:[#allocation5 + $0x300] sm:$0xff]  ;;  %v457_v31 = vld [vmem:[#allocation5 + $0x390] sm:$0xff]  ;;  %v460_v32 = vld [vmem:[#allocation5 + $0x3a8] sm:$0xff] }
  0x8a   :  { %998 = vmatprep.subr.bf16.mxu1 %v997_v35  ;;  %v427_v35 = vld [vmem:[#allocation5 + $0x2a0] sm:$0xff] }
  0x8d   :  { %1000 = vmatpush3.bf16.msra.mxu1 %v999_v40  ;;  %v161_v40 = vsub.s32 3, %v1234_v48 }
  0x8e   :  { %1002 = vmatprep.subr.bf16.mxu1 %v1001_v41  ;;  %v939_v41 = vpack.c.bf16 %v429_v36, %v427_v35  ;;  %v459_v36 = vld [vmem:[#allocation5 + $0x3a0] sm:$0xff] }
  0x91   :  { %1004 = vmatpush3.bf16.msra.mxu1 %v1003_v0  ;;  %v162_v0 = vrot.slane %v1242_v50, %v161_v40 }
  0x92   :  { %1006 = vmatprep.subr.bf16.mxu1 %v1005_v46  ;;  %v436_v46 = vld [vmem:[#allocation5 + $0x2e8] sm:$0xff] }
  0x93   :  { %v945_v48 = vpack.c.bf16 %v438_v47, %v436_v46  ;;  %v467_v47 = vld [vmem:[#allocation5 + $0x3e0] sm:$0xff] }
  0xc6   :  { %v1249_v53 = vpop.permute.xlu0 %143 }
  0xc7   :  { %v167_v56 = vmul.f32 %v150_v52, %v1249_v53  ;;  %v168_v57 = vmul.f32 %v154_v54, %v1249_v53  ;;  %v943_v52 = vpack.c.bf16 %v433_v45, %v431_v44  ;;  %v169_v54 = vmul.f32 %v158_v42, %v1249_v53  ;;  %v463_v42 = vld [vmem:[#allocation5 + $0x3c0] sm:$0xff]  ;;  %v468_v44 = vld [vmem:[#allocation5 + $0x3e8] sm:$0xff]  ;;  %v470_v45 = vld [vmem:[#allocation5 + $0x3f8] sm:$0xff] }
  0xc8   :  { %v977_v46 = vpack.c.bf16 %v470_v45, %v468_v44 }
 0x12f   :  { %v237_v59 = vpop.f32.mrb[0].mxu1 }
 0x130   :  { %v238_v60 = vadd.f32 %v237_v59, %v167_v56  ;;  %v239_v61 = vpop.f32.mrb[1].mxu1  ;;  %v326_v56 = vrot.slane %v1256_v55, %v157_v37  ;;  %v461_v37 = vld [vmem:[#allocation5 + $0x3b0] sm:$0xff] }
 0x131   :  { %v240_v62 = vadd.f32 %v239_v61, %v168_v57  ;;  %v435_v57 = vld [vmem:[#allocation5 + $0x2e0] sm:$0xff]  ;;  %v440_v61 = vld [vmem:[#allocation5 + $0x308] sm:$0xff] }
 0x132   :  { %v335_v63 = vadd.f32 %v318_v58, %v238_v60  ;;  %v437_v58 = vld [vmem:[#allocation5 + $0x2f0] sm:$0xff]  ;;  %v330_v60 = vrot.slane %v1256_v55, %v161_v40  ;;  %v971_v40 = vpack.c.bf16 %v461_v37, %v459_v36 }
 0x133   :  { %v336_v3 = vadd.f32 %v322_v18, %v240_v62  ;;  %v170_v18 = vmul.f32 %v162_v0, %v1249_v53  ;;  %v442_v62 = vld [vmem:[#allocation5 + $0x318] sm:$0xff]  ;;  %v947_v2 = vpack.c.bf16 %v437_v58, %v435_v57  ;;  %v640_v57 = vld [vmem:[#allocation7 + $0x68] sm:$0xff] }
 0x134   :  { %v339_v8 = vmax.f32 %v335_v63, 0.0  ;;  %v949_v4 = vpack.c.bf16 %v442_v62, %v440_v61  ;;  %v641_v61 = vld [vmem:[#allocation7 + $0x70] sm:$0xff]  ;;  %v642_v62 = vld [vmem:[#allocation7 + $0x78] sm:$0xff] }
 0x135   :  { %v340_v6 = vmax.f32 %v336_v3, 0.0 }
 0x137   :  { %547 = vmatprep.mubr.f32.mxu0 %v340_v6  ;;  %v441_v6 = vld [vmem:[#allocation5 + $0x310] sm:$0xff] }
 0x138   :  { %548 = vmatmul.mubr.f32.vlgmr.msra.gmra.mrb[0].mxu0 %v339_v8  ;;  %v444_v8 = vld [vmem:[#allocation5 + $0x328] sm:$0xff]  ;;  %v951_v53 = vpack.c.bf16 %v441_v6, %v439_v5 }
 0x139   :  { %920 = vmatpush1.bf16.msra.mxu0 %v919_v7 }
 0x13a   :  { %922 = vmatprep.subr.bf16.mxu0 %v921_v9  ;;  %v446_v9 = vld [vmem:[#allocation5 + $0x338] sm:$0xff] }
 0x13b   :  { %v953_v55 = vpack.c.bf16 %v446_v9, %v444_v8 }
 0x13d   :  { %924 = vmatpush1.bf16.msra.mxu0 %v923_v14  ;;  %v450_v14 = vld [vmem:[#allocation5 + $0x358] sm:$0xff] }
 0x13e   :  { %926 = vmatprep.subr.bf16.mxu0 %v925_v15  ;;  %v955_v15 = vpack.c.bf16 %v445_v12, %v443_v11  ;;  %v957_v16 = vpack.c.bf16 %v450_v14, %v448_v13 }
 0x141   :  { %928 = vmatpush1.bf16.msra.mxu0 %v927_v21  ;;  %v454_v21 = vld [vmem:[#allocation5 + $0x378] sm:$0xff] }
 0x142   :  { %930 = vmatprep.subr.bf16.mxu0 %v929_v22  ;;  %v959_v22 = vpack.c.bf16 %v449_v19, %v447_v17  ;;  %v961_v23 = vpack.c.bf16 %v454_v21, %v452_v20 }
 0x145   :  { %932 = vmatpush1.bf16.msra.mxu0 %v931_v27  ;;  %v458_v27 = vld [vmem:[#allocation5 + $0x398] sm:$0xff] }
 0x146   :  { %934 = vmatprep.subr.bf16.mxu0 %v933_v28  ;;  %v963_v28 = vpack.c.bf16 %v453_v25, %v451_v24  ;;  %v965_v29 = vpack.c.bf16 %v458_v27, %v456_v26 }
 0x149   :  { %936 = vmatpush1.bf16.msra.mxu0 %v935_v33  ;;  %v462_v33 = vld [vmem:[#allocation5 + $0x3b8] sm:$0xff] }
 0x14a   :  { %938 = vmatprep.subr.bf16.mxu0 %v937_v34  ;;  %v967_v34 = vpack.c.bf16 %v457_v31, %v455_v30  ;;  %v969_v35 = vpack.c.bf16 %v462_v33, %v460_v32 }
 0x14d   :  { %940 = vmatpush1.bf16.msra.mxu0 %v939_v41  ;;  %v973_v41 = vpack.c.bf16 %v466_v39, %v464_v38 }
 0x14e   :  { %942 = vmatprep.subr.bf16.mxu0 %v941_v43  ;;  %v465_v43 = vld [vmem:[#allocation5 + $0x3d0] sm:$0xff] }
 0x14f   :  { %v308_v59 = vpop.f32.mrb[2].mxu1  ;;  %v975_v0 = vpack.c.bf16 %v465_v43, %v463_v42 }
 0x150   :  { %v309_v50 = vadd.f32 %v308_v59, %v169_v54  ;;  %v310_v63 = vpop.f32.mrb[3].mxu1  ;;  %v657_v59 = vld [vmem:[#allocation7 + $0xf0] sm:$0xff] }
 0x151   :  { %v311_v1 = vadd.f32 %v310_v63, %v170_v18  ;;  %944 = vmatpush1.bf16.msra.mxu0 %v943_v52  ;;  %v469_v52 = vld [vmem:[#allocation5 + $0x3f0] sm:$0xff]  ;;  %v658_v18 = vld [vmem:[#allocation7 + $0xf8] sm:$0xff]  ;;  %v471_v63 = vld [vmem:[%s1301_s6] sm:$0x3]  ;;  %s743_s6 = sshll.u32 %s1135_s13, 4  ;;  %s744_s6 = int_to_ptr.vmem [resolvable:$true] %s743_s6 }
 0x152   :  { %v1272_v3 = vadd.f32 %v326_v56, %v309_v50  ;;  %946 = vmatprep.subr.bf16.mxu0 %v945_v48  ;;  %v979_v54 = vpack.c.bf16 %v469_v52, %v467_v47  ;;  %v639_v48 = vld [vmem:[#allocation7 + $0x60] sm:$0xff]  ;;  %v1011_v50 = vpack.c.bf16 %v642_v62, %v641_v61  ;;  %s1096_s14 = scalar_lea.vmem %s744_s6, 32  ;;  %p1101_p11 = scmp.lt.s32.totalorder %s744_s6, %s744_s6 }
 0x153   :  { %v338_v7 = vadd.f32 %v330_v60, %v311_v1  ;;  %v1007_v58 = vpack.c.bf16 %v640_v57, %v639_v48  ;;  %v1009_v60 = vpack.c.bf16 %v658_v18, %v657_v59  ;;  %v476_v1 = vrot.slane %v471_v63, %v1237_v49  ;;  %p1097_p10 = scmp.ne.s32.totalorder %s744_s6, %s1096_s14  ;;  %p1102_p12 = scmp.lt.s32.totalorder %s1096_s14, %s1096_s14 }
 0x154   :  { %v341_v56 = vmax.f32 %v1272_v3, 0.0 }
 0x155   :  { %v342_v10 = vmax.f32 %v338_v7, 0.0  ;;  %948 = vmatpush1.bf16.msra.mxu0 %v947_v2  ;;  %1008 = vmatpush3.bf16.msra.mxu1 %v1007_v58  ;;  %v480_v2 = vrot.slane %v471_v63, %v1245_v51  ;;  %p1103_p13 = por %p1102_p12, %p1101_p11 }
 0x156   :  { %950 = vmatprep.subr.bf16.mxu0 %v949_v4  ;;  %1010 = vmatprep.subr.bf16.mxu1 %v1009_v60 }
 0x157   :  { %618 = vmatprep.mubr.f32.mxu0 %v342_v10  ;;  %v753_v10 = vld [vmem:[%s1303_s8] ss:$0 sm:$0xff]  ;;  %p1104_p0 = pnand %p1103_p13, %p1097_p10 }
 0x159   :  { %952 = vmatpush1.bf16.msra.mxu0 %v951_v53  ;;  %1012 = vmatpush3.bf16.msra.mxu1 %v1011_v50 }
 0x15a   :  { %954 = vmatprep.subr.bf16.mxu0 %v953_v55 }
 0x15d   :  { %956 = vmatpush1.bf16.msra.mxu0 %v955_v15 }
 0x15e   :  { %958 = vmatprep.subr.bf16.mxu0 %v957_v16 }
 0x161   :  { %960 = vmatpush1.bf16.msra.mxu0 %v959_v22 }
 0x162   :  { %962 = vmatprep.subr.bf16.mxu0 %v961_v23 }
 0x165   :  { %964 = vmatpush1.bf16.msra.mxu0 %v963_v28 }
 0x166   :  { %966 = vmatprep.subr.bf16.mxu0 %v965_v29 }
 0x169   :  { %968 = vmatpush1.bf16.msra.mxu0 %v967_v34 }
 0x16a   :  { %970 = vmatprep.subr.bf16.mxu0 %v969_v35 }
 0x16d   :  { %972 = vmatpush1.bf16.msra.mxu0 %v971_v40 }
 0x16e   :  { %974 = vmatprep.subr.bf16.mxu0 %v973_v41 }
 0x171   :  { %976 = vmatpush1.bf16.msra.mxu0 %v975_v0 }
 0x172   :  { %978 = vmatprep.subr.bf16.mxu0 %v977_v46 }
 0x175   :  { %980 = vmatpush1.bf16.msra.mxu0 %v979_v54 }
 0x178   :  { %619 = vmatmul.mubr.f32.vlgmr.msra.gmra.mrb[0].mxu0 %v341_v56 }
 0x24b   :  { %v620_v3 = vpop.f32.mrb[0].mxu0 }
 0x24c   :  { %v1013_v4 = vadd.f32 %v620_v3, %v476_v1  ;;  %v622_v5 = vpop.f32.mrb[1].mxu0 }
 0x24d   :  { %v1014_v6 = vadd.f32 %v622_v5, %v480_v2 }
 0x24e   :  { %v625_v8 = vmax.f32 %v1013_v4, 0.0 }
 0x24f   :  { %v626_v7 = vmax.f32 %v1014_v6, 0.0 }
 0x251   :  { %730 = vmatprep.mubr.f32.mxu1 %v626_v7 }
 0x252   :  { %731 = vmatmul.mubr.f32.vlgmr.msra.gmra.mrb[4].mxu1 %v625_v8 }
 0x325   :  { %v786_v9 = vpop.f32.mrb[4].mxu1 }
 0x326   :  { %v787_v53 = vpop.f32.mrb[5].mxu1 }
 0x327   :  { %v788_v55 = vadd.f32 %v787_v53, %v786_v9 }
 0x329   :  { %v733_v49 = vadd.f32 %v788_v55, %v753_v10 }
 0x32b   :  { %736 = vst [vmem:[#allocation8] sm:$0x3] %v733_v49 }
 0x32c   :  { %1107 = shalt.err (!%p1104_p0)
}
 0x32d   :  { %s1108_s17 = scalar_lea.hbm %s1304_s9, 32 }
 0x32e   :  { %p1109_p1 = scmp.ne.s32.totalorder %s1304_s9, %s1108_s17  ;;  %p1112_p2 = scmp.lt.u32.totalorder %s1108_s17, %s1304_s9 }
 0x330   :  { %p1114_p3 = pnand %p1112_p2, %p1109_p1 }
 0x332   :  { %1117 = shalt.err (!%p1114_p3)
}
 0x333   :  { %746 = dma.vmem_to_hbm [thread:$0]  %s744_s6, 32, %s1304_s9, [#allocation4]  }
 0x334   :  { %1122 = dma.done.wait [#allocation4], 32  }
 0x335   :  { %1123 = vsyncadd [#allocation4], 4294967264 }
 0x336   :  { %750 = vsyncpa [#allocation3], 1 }
 0x337   :  { %751 = vsyncpa [#allocation6], 1 }
 0x338   :  { %752 = vsyncpa [#allocation4], 1 }

</bundles_post_ra>
